<compile_context>
chip_gen: v6e
topology: v6e:2x2x1
jax: 0.10.0
libtpu: 0.0.40
codegen_flags: <defaults>
</compile_context>

<pallas_src>
import functools

import jax
import jax.numpy as jnp
from jax.experimental import pallas as pl
from jax.experimental.pallas import tpu as pltpu


_UNROLL_THRESHOLD = 8  # fully unroll the disparity loop only for tiny D


def _round_up(x, m):
    return ((x + m - 1) // m) * m


def _vmem_capacity_bytes():
    # Per-chip VMEM (v5e/v6e: 128 MiB, v7x: 64 MiB).  Fall back conservatively.
    try:
        return int(pltpu.get_tpu_info().vmem_capacity_bytes)
    except Exception:
        return 64 * 1024 * 1024


def _cost_volume_kernel(x_ref, y_ref, o_ref, *, D, W):
    # x_ref / y_ref block: (Cg, tH, W)   o_ref block: (D, tH, W)
    x = x_ref[...].astype(jnp.float32)   # single upfront f32 cast (v5e has no bf16 VPU)
    y = y_ref[...].astype(jnp.float32)

    # d = 0: no shift, no mask.
    o_ref[0] = jnp.sum(x * y, axis=0).astype(o_ref.dtype)
    if D == 1:
        return

    _, th, w = x.shape
    col = jax.lax.broadcasted_iota(jnp.int32, (th, w), 1)   # column index per pixel

    if D <= _UNROLL_THRESHOLD:
        # Tiny disparity count: static unroll, roll the resident y by d.
        for d in range(1, D):
            y_shift = pltpu.roll(y, shift=d % W, axis=2)
            cost = jnp.sum(x * y_shift, axis=0)              # (tH, W), f32 accumulation
            o_ref[d] = jnp.where(col >= d, cost, 0.0).astype(o_ref.dtype)
    else:
        # Realistic maxdisp: independent iterations (no carried rolled copy),
        # modest unroll for XLU/VALU/store co-issue.
        def body(d, carry):
            y_shift = pltpu.roll(y, shift=d % W, axis=2)     # XLU lane rotate by d
            cost = jnp.sum(x * y_shift, axis=0)              # (tH, W), f32 accumulation
            o_ref[d] = jnp.where(col >= d, cost, 0.0).astype(o_ref.dtype)
            return carry

        jax.lax.fori_loop(1, D, body, None, unroll=2)


def coex_cost_volume(x, y, maxdisp, group=1, out_dtype=None):
    """x, y: (B, C, H, W) -> cost: (B, group, maxdisp + 1, H, W)."""
    b, c, h, w = x.shape
    assert c % group == 0
    D = maxdisp + 1
    cg = c // group
    out_dtype = x.dtype if out_dtype is None else out_dtype

    itemsize = jnp.dtype(x.dtype).itemsize
    out_itemsize = jnp.dtype(out_dtype).itemsize
    sub = 8 if itemsize >= 4 else (16 if itemsize == 2 else 32)

    # Per-chip VMEM budgets: ~48 MiB of pipelined tiles / ~96 MiB limit on
    # v5e/v6e (128 MiB VMEM), half of that on v7x (64 MiB/TC).
    vmem_cap = _vmem_capacity_bytes()
    vmem_limit = min((3 * vmem_cap) // 4, 96 * 1024 * 1024)
    pipeline_budget = min(vmem_cap // 2, 48 * 1024 * 1024)

    # Bytes per H-row of one grid step: double-buffered DMA tiles plus the
    # in-kernel f32 working set (resident f32 x/y, rolled-y temporaries for
    # unroll=2, and a few (tH, W) f32 temps).
    per_row_bytes = w * (
        2 * 2 * cg * itemsize        # x, y input tiles, double-buffered
        + 2 * D * out_itemsize       # output tile, double-buffered
        + 2 * cg * 4                 # resident f32 copies of x and y
        + 3 * cg * 4                 # rolled-y temporaries / product slack
        + 4 * 4)                     # f32 cost / mask / iota temporaries
    th_budget = max(sub, (pipeline_budget // per_row_bytes) // sub * sub)

    # Balanced H tiling (edge tile is a partial block; no HBM padding), with
    # enough grid steps to keep both v7x TensorCores busy.
    n_h = pl.cdiv(h, th_budget)
    if b * group * n_h < 4:
        n_h = min(pl.cdiv(4, b * group), pl.cdiv(h, sub))
    th = min(h, _round_up(pl.cdiv(h, n_h), sub))   # full-extent or sublane-aligned
    grid_h = pl.cdiv(h, th)

    # Free reshapes only (contiguous channel split); no materialized padding.
    xg = x.reshape(b, group, cg, h, w)
    yg = y.reshape(b, group, cg, h, w)

    kernel = functools.partial(_cost_volume_kernel, D=D, W=w)

    in_spec = pl.BlockSpec((None, None, cg, th, w),
                           lambda bi, gi, hi: (bi, gi, 0, hi, 0))
    out_spec = pl.BlockSpec((None, None, D, th, w),
                            lambda bi, gi, hi: (bi, gi, 0, hi, 0))

    return pl.pallas_call(
        kernel,
        out_shape=jax.ShapeDtypeStruct((b, group, D, h, w), out_dtype),
        grid=(b, group, grid_h),
        in_specs=[in_spec, in_spec],
        out_specs=out_spec,
        compiler_params=pltpu.CompilerParams(
            dimension_semantics=("parallel", "parallel", "parallel"),
            vmem_limit_bytes=vmem_limit),
    )(xg, yg)


def _reference_cost_volume(x, y, maxdisp, group=1):
    # Pure-JAX reference matching the PyTorch module exactly.
    b, c, h, w = x.shape
    D = maxdisp + 1
    cg = c // group
    xg = x.reshape(b, group, cg, h, w)
    yg = y.reshape(b, group, cg, h, w)
    costs = []
    for d in range(D):
        y_shift = jnp.pad(yg, ((0, 0), (0, 0), (0, 0), (0, 0), (d, 0)))[..., :w]
        costs.append(jnp.sum(xg * y_shift, axis=2))
    return jnp.stack(costs, axis=2)


if __name__ == "__main__":
    def _run_case(B, C, H, W, maxdisp, group):
        key = jax.random.PRNGKey(0)
        kx, ky = jax.random.split(key)
        x = jax.random.normal(kx, (B, C, H, W), dtype=jnp.float32)
        y = jax.random.normal(ky, (B, C, H, W), dtype=jnp.float32)

        out = jax.block_until_ready(coex_cost_volume(x, y, maxdisp, group))
        ref = _reference_cost_volume(x, y, maxdisp, group)

        assert out.shape == (B, group, maxdisp + 1, H, W), out.shape
        assert jnp.allclose(out, ref, atol=1e-5, rtol=1e-5), "mismatch vs reference"

    # Small D -> fully unrolled disparity loop, aligned shapes.
    _run_case(B=2, C=4, H=16, W=16, maxdisp=4, group=1)
    # Larger D -> fori_loop path, group > 1, H/W not sublane/lane aligned
    # (exercises partial edge H tile and non-128 W blocks).
    _run_case(B=1, C=8, H=20, W=24, maxdisp=12, group=2)

    print("KERNEL_OK")
</pallas_src>

<mosaic_0001>
module attributes {stable_mosaic.version = 11 : i64} {
  func.func @_cost_volume_kernel(%arg0: i32, %arg1: i32, %arg2: i32, %arg3: memref<1x1x4x8x16xf32, #tpu.memory_space<vmem>>, %arg4: memref<1x1x4x8x16xf32, #tpu.memory_space<vmem>>, %arg5: memref<1x1x5x8x16xf32, #tpu.memory_space<vmem>>) attributes {dimension_semantics = [#tpu.dimension_semantics<parallel>, #tpu.dimension_semantics<parallel>, #tpu.dimension_semantics<parallel>], iteration_bounds = array<i64: 2, 1, 2>, scalar_prefetch = 0 : i64, scratch_operands = 0 : i64, tpu.core_type = #tpu.core_type<tc>, window_params = [{transform_indices = @transform_0, window_bounds = array<i64: 1, 1, 4, 8, 16>}, {transform_indices = @transform_1, window_bounds = array<i64: 1, 1, 4, 8, 16>}, {transform_indices = @transform_2, window_bounds = array<i64: 1, 1, 5, 8, 16>}]} {
    %c0 = arith.constant 0 : index
    %c0_0 = arith.constant 0 : index
    %c0_1 = arith.constant 0 : index
    %c0_2 = arith.constant 0 : index
    %c0_3 = arith.constant 0 : index
    %0 = vector.load %arg3[%c0, %c0_0, %c0_1, %c0_2, %c0_3] : memref<1x1x4x8x16xf32, #tpu.memory_space<vmem>>, vector<1x1x4x8x16xf32>
    %1 = vector.shape_cast %0 : vector<1x1x4x8x16xf32> to vector<4x8x16xf32>
    %c0_4 = arith.constant 0 : index
    %c0_5 = arith.constant 0 : index
    %c0_6 = arith.constant 0 : index
    %c0_7 = arith.constant 0 : index
    %c0_8 = arith.constant 0 : index
    %2 = vector.load %arg4[%c0_4, %c0_5, %c0_6, %c0_7, %c0_8] : memref<1x1x4x8x16xf32, #tpu.memory_space<vmem>>, vector<1x1x4x8x16xf32>
    %3 = vector.shape_cast %2 : vector<1x1x4x8x16xf32> to vector<4x8x16xf32>
    %4 = arith.mulf %1, %3 : vector<4x8x16xf32>
    %cst = arith.constant dense<0.000000e+00> : vector<8x16xf32>
    %5 = vector.multi_reduction <add>, %4, %cst [0] : vector<4x8x16xf32> to vector<8x16xf32>
    %c0_9 = arith.constant 0 : index
    %c0_10 = arith.constant 0 : index
    %c0_11 = arith.constant 0 : index
    %c0_12 = arith.constant 0 : index
    %c0_13 = arith.constant 0 : index
    %6 = vector.load %arg5[%c0_9, %c0_10, %c0_11, %c0_12, %c0_13] : memref<1x1x5x8x16xf32, #tpu.memory_space<vmem>>, vector<1x1x1x8x16xf32>
    %7 = vector.shape_cast %6 : vector<1x1x1x8x16xf32> to vector<8x16xf32>
    %8 = vector.shape_cast %5 : vector<8x16xf32> to vector<1x1x1x8x16xf32>
    tpu.vector_store %arg5[%c0_9, %c0_10, %c0_11, %c0_12, %c0_13], %8 {strides = array<i32>} : memref<1x1x5x8x16xf32, #tpu.memory_space<vmem>>, vector<1x1x1x8x16xf32>,
    %9 = tpu.iota {dimensions = array<i32: 1>} : vector<8x16xi32>
    %c1_i32 = arith.constant 1 : i32
    %10 = tpu.dynamic_rotate %3 by %c1_i32 dim 2 : vector<4x8x16xf32>, i32 -> vector<4x8x16xf32>
    %11 = arith.mulf %1, %10 : vector<4x8x16xf32>
    %cst_14 = arith.constant dense<0.000000e+00> : vector<8x16xf32>
    %12 = vector.multi_reduction <add>, %11, %cst_14 [0] : vector<4x8x16xf32> to vector<8x16xf32>
    %c1_i32_15 = arith.constant 1 : i32
    %13 = vector.broadcast %c1_i32_15 : i32 to vector<8x16xi32>
    %14 = arith.cmpi sge, %9, %13 : vector<8x16xi32>
    %cst_16 = arith.constant 0.000000e+00 : f32
    %15 = vector.broadcast %cst_16 : f32 to vector<8x16xf32>
    %16 = arith.select %14, %12, %15 : vector<8x16xi1>, vector<8x16xf32>
    %c0_17 = arith.constant 0 : index
    %c0_18 = arith.constant 0 : index
    %c1 = arith.constant 1 : index
    %c0_19 = arith.constant 0 : index
    %c0_20 = arith.constant 0 : index
    %17 = vector.load %arg5[%c0_17, %c0_18, %c1, %c0_19, %c0_20] : memref<1x1x5x8x16xf32, #tpu.memory_space<vmem>>, vector<1x1x1x8x16xf32>
    %18 = vector.shape_cast %17 : vector<1x1x1x8x16xf32> to vector<8x16xf32>
    %19 = vector.shape_cast %16 : vector<8x16xf32> to vector<1x1x1x8x16xf32>
    tpu.vector_store %arg5[%c0_17, %c0_18, %c1, %c0_19, %c0_20], %19 {strides = array<i32>} : memref<1x1x5x8x16xf32, #tpu.memory_space<vmem>>, vector<1x1x1x8x16xf32>,
    %c2_i32 = arith.constant 2 : i32
    %20 = tpu.dynamic_rotate %3 by %c2_i32 dim 2 : vector<4x8x16xf32>, i32 -> vector<4x8x16xf32>
    %21 = arith.mulf %1, %20 : vector<4x8x16xf32>
    %cst_21 = arith.constant dense<0.000000e+00> : vector<8x16xf32>
    %22 = vector.multi_reduction <add>, %21, %cst_21 [0] : vector<4x8x16xf32> to vector<8x16xf32>
    %c2_i32_22 = arith.constant 2 : i32
    %23 = vector.broadcast %c2_i32_22 : i32 to vector<8x16xi32>
    %24 = arith.cmpi sge, %9, %23 : vector<8x16xi32>
    %cst_23 = arith.constant 0.000000e+00 : f32
    %25 = vector.broadcast %cst_23 : f32 to vector<8x16xf32>
    %26 = arith.select %24, %22, %25 : vector<8x16xi1>, vector<8x16xf32>
    %c0_24 = arith.constant 0 : index
    %c0_25 = arith.constant 0 : index
    %c2 = arith.constant 2 : index
    %c0_26 = arith.constant 0 : index
    %c0_27 = arith.constant 0 : index
    %27 = vector.load %arg5[%c0_24, %c0_25, %c2, %c0_26, %c0_27] : memref<1x1x5x8x16xf32, #tpu.memory_space<vmem>>, vector<1x1x1x8x16xf32>
    %28 = vector.shape_cast %27 : vector<1x1x1x8x16xf32> to vector<8x16xf32>
    %29 = vector.shape_cast %26 : vector<8x16xf32> to vector<1x1x1x8x16xf32>
    tpu.vector_store %arg5[%c0_24, %c0_25, %c2, %c0_26, %c0_27], %29 {strides = array<i32>} : memref<1x1x5x8x16xf32, #tpu.memory_space<vmem>>, vector<1x1x1x8x16xf32>,
    %c3_i32 = arith.constant 3 : i32
    %30 = tpu.dynamic_rotate %3 by %c3_i32 dim 2 : vector<4x8x16xf32>, i32 -> vector<4x8x16xf32>
    %31 = arith.mulf %1, %30 : vector<4x8x16xf32>
    %cst_28 = arith.constant dense<0.000000e+00> : vector<8x16xf32>
    %32 = vector.multi_reduction <add>, %31, %cst_28 [0] : vector<4x8x16xf32> to vector<8x16xf32>
    %c3_i32_29 = arith.constant 3 : i32
    %33 = vector.broadcast %c3_i32_29 : i32 to vector<8x16xi32>
    %34 = arith.cmpi sge, %9, %33 : vector<8x16xi32>
    %cst_30 = arith.constant 0.000000e+00 : f32
    %35 = vector.broadcast %cst_30 : f32 to vector<8x16xf32>
    %36 = arith.select %34, %32, %35 : vector<8x16xi1>, vector<8x16xf32>
    %c0_31 = arith.constant 0 : index
    %c0_32 = arith.constant 0 : index
    %c3 = arith.constant 3 : index
    %c0_33 = arith.constant 0 : index
    %c0_34 = arith.constant 0 : index
    %37 = vector.load %arg5[%c0_31, %c0_32, %c3, %c0_33, %c0_34] : memref<1x1x5x8x16xf32, #tpu.memory_space<vmem>>, vector<1x1x1x8x16xf32>
    %38 = vector.shape_cast %37 : vector<1x1x1x8x16xf32> to vector<8x16xf32>
    %39 = vector.shape_cast %36 : vector<8x16xf32> to vector<1x1x1x8x16xf32>
    tpu.vector_store %arg5[%c0_31, %c0_32, %c3, %c0_33, %c0_34], %39 {strides = array<i32>} : memref<1x1x5x8x16xf32, #tpu.memory_space<vmem>>, vector<1x1x1x8x16xf32>,
    %c4_i32 = arith.constant 4 : i32
    %40 = tpu.dynamic_rotate %3 by %c4_i32 dim 2 : vector<4x8x16xf32>, i32 -> vector<4x8x16xf32>
    %41 = arith.mulf %1, %40 : vector<4x8x16xf32>
    %cst_35 = arith.constant dense<0.000000e+00> : vector<8x16xf32>
    %42 = vector.multi_reduction <add>, %41, %cst_35 [0] : vector<4x8x16xf32> to vector<8x16xf32>
    %c4_i32_36 = arith.constant 4 : i32
    %43 = vector.broadcast %c4_i32_36 : i32 to vector<8x16xi32>
    %44 = arith.cmpi sge, %9, %43 : vector<8x16xi32>
    %cst_37 = arith.constant 0.000000e+00 : f32
    %45 = vector.broadcast %cst_37 : f32 to vector<8x16xf32>
    %46 = arith.select %44, %42, %45 : vector<8x16xi1>, vector<8x16xf32>
    %c0_38 = arith.constant 0 : index
    %c0_39 = arith.constant 0 : index
    %c4 = arith.constant 4 : index
    %c0_40 = arith.constant 0 : index
    %c0_41 = arith.constant 0 : index
    %47 = vector.load %arg5[%c0_38, %c0_39, %c4, %c0_40, %c0_41] : memref<1x1x5x8x16xf32, #tpu.memory_space<vmem>>, vector<1x1x1x8x16xf32>
    %48 = vector.shape_cast %47 : vector<1x1x1x8x16xf32> to vector<8x16xf32>
    %49 = vector.shape_cast %46 : vector<8x16xf32> to vector<1x1x1x8x16xf32>
    tpu.vector_store %arg5[%c0_38, %c0_39, %c4, %c0_40, %c0_41], %49 {strides = array<i32>} : memref<1x1x5x8x16xf32, #tpu.memory_space<vmem>>, vector<1x1x1x8x16xf32>,
    return
  }
  func.func @transform_0(%arg0: i32, %arg1: i32, %arg2: i32) -> (i32, i32, i32, i32, i32) {
    %c0_i32 = arith.constant 0 : i32
    %c0_i32_0 = arith.constant 0 : i32
    %c0_i32_1 = arith.constant 0 : i32
    return %arg0, %arg1, %c0_i32, %arg2, %c0_i32_0 : i32, i32, i32, i32, i32
  }
  func.func @transform_1(%arg0: i32, %arg1: i32, %arg2: i32) -> (i32, i32, i32, i32, i32) {
    %c0_i32 = arith.constant 0 : i32
    %c0_i32_0 = arith.constant 0 : i32
    %c0_i32_1 = arith.constant 0 : i32
    return %arg0, %arg1, %c0_i32, %arg2, %c0_i32_0 : i32, i32, i32, i32, i32
  }
  func.func @transform_2(%arg0: i32, %arg1: i32, %arg2: i32) -> (i32, i32, i32, i32, i32) {
    %c0_i32 = arith.constant 0 : i32
    %c0_i32_0 = arith.constant 0 : i32
    %c0_i32_1 = arith.constant 0 : i32
    return %arg0, %arg1, %c0_i32, %arg2, %c0_i32_0 : i32, i32, i32, i32, i32
  }
}

</mosaic_0001>

<bundles_post_ra>
// kernel: tpu_custom_call.1
= control target key start
LH: loop header
LB: loop body
LE: loop exit
PB: predicated region body
PF: predicated region fallthrough
CT: control target
= control target key end

     0   :  { %s1139_s0 = inlined_call_operand.hbm [shape: f32[2,1,4,16,16], index: 0, kind: input, shape index: {}]   ;;  %s1140_s1 = inlined_call_operand.hbm [shape: f32[2,1,4,16,16], index: 1, kind: input, shape index: {}]   ;;  %s1141_s2 = inlined_call_operand.hbm [shape: f32[2,1,5,16,16], index: 2, kind: output, shape index: {}]  }
   0x1   :  { %1145 = sst [smem:[#allocation14_spill]] %s1139_s0 }
   0x2   :  { %7 = vsyncpa [#allocation3], 0 }
   0x3   :  { %9 = vsyncpa [#allocation3 + $0x1], 0 }
   0x4   :  { %10 = vsyncpa [#allocation6], 0 }
   0x5   :  { %12 = vsyncpa [#allocation6 + $0x1], 0 }
   0x6   :  { %13 = vsyncpa [#allocation4], 0 }
   0x7   :  { %15 = vsyncpa [#allocation4 + $0x1], 0  ;;  %s841_s9 = smov 0   ;;  %s843_s10 = smov 0  }
   0x8   :  { %s845_s11 = smov 0   ;;  %s847_s12 = smov 0  }
   0x9   :  { %s849_s13 = smov 0   ;;  %s851_s14 = smov 0  }
   0xa   :  { %s853_s15 = smov 0   ;;  %s855_s16 = smov 0  }
   0xb LB: > { %1146 = sst [smem:[#allocation11_spill]] %s806_s15  ;;  %s538_s17 = sadd.s32 4294967295, %s810_s16   ;;  %s810_s16 = sphi %s855_s16, %s21_s16   ;;  %s806_s15 = sphi %s853_s15, %s1158_s15   ;;  %s802_s14 = sphi %s851_s14, %s1163_s14   ;;  %s798_s13 = sphi %s849_s13, %s1156_s13   ;;  %s794_s12 = sphi %s847_s12, %s1162_s12   ;;  %s790_s11 = sphi %s845_s11, %s1161_s11   ;;  %s786_s10 = sphi %s843_s10, %s1160_s10   ;;  %s782_s9 = sphi %s841_s9, %s1159_s9  }
   0xc   : > { %s539_s18 = sadd.s32 4294967294, %s810_s16   ;;  %s33_s19 = sadd.s32 1, %s802_s14 }
   0xd   : > { %s40_s20 = sadd.s32 1, %s806_s15  ;;  %p34_p0 = scmp.ge.s32.totalorder %s33_s19, 2 }
   0xe   : > { %s51_s21 = sadd.s32 1, %s790_s11  ;;  %p58_p1 = scmp.ne.s32.totalorder %s790_s11, %s786_s10 }
   0xf   : > { %p59_p2 = scmp.eq.s32.totalorder %s810_s16, 0  ;;  %s1165_s19 = smov (%p34_p0, %s33_s19), 0 }
  0x10   : > { %1147 = sst [smem:[#allocation12_spill]] %s1165_s19  ;;  %s1167_s20 = smov (!%p34_p0, %s40_s20), %s806_s15 }
  0x11   : > { %s47_s22 = ssub.s32 %s802_s14, %s1165_s19  ;;  %p894_p3 = por %p59_p2, %p58_p1 }
  0x12   : > { %p42_p4 = scmp.ge.s32.totalorder %s1167_s20, 2  ;;  %p64_p5 = scmp.ne.s32.totalorder %s786_s10, %s782_s9 }
  0x13   : > { %p65_p6 = scmp.eq.s32.totalorder %s538_s17, 0  ;;  %p122_p7 = scmp.eq.s32.totalorder %s538_s17, 3 }
  0x14   : > { %s1169_s20 = smov (%p42_p4, %s1167_s20), 0  ;;  %p128_p10 = scmp.eq.s32.totalorder %s539_s18, 3 }
  0x15   : > { %1149 = sst [smem:[#allocation13_spill]] %s1169_s20  ;;  %p902_p8 = por %p65_p6, %p64_p5 }
  0x16   : > { %p906_p9 = por %p122_p7, %p58_p1  ;;  %s44_s26 = ssub.s32 %s806_s15, %s1169_s20 }
  0x17   : > { %s48_s27 = sor.u32 %s47_s22, %s44_s26  ;;  %p912_p12 = por %p128_p10, %p64_p5 }
  0x18   : > { %p49_p11 = scmp.eq.s32.totalorder %s48_s27, 0  ;;  %p577_p13 = scmp.lt.s32.totalorder %s810_s16, 4 }
  0x19   : > { %s918_s29 = sand.u32 1, %s790_s11   ;;  %s543_s4 = sshll.u32 %s806_s15, 3 }
  0x1a   : > { %s921_s30 = scalar_select %p49_p11, %s790_s11, %s51_s21  }
  0x1b   : > { %s542_s3 = sshll.u32 %s918_s29, 5  ;;  %s926_s5 = sadd.s32 %s802_s14, %s543_s4 }
  0x1c   : > { %s152_s6 = scalar_lea.vmem [#allocation2], %s542_s3  ;;  %s544_s8 = sshll.u32 %s926_s5, 7 }
  0x1d   : > { %s162_s7 = sshll.u32 %s152_s6, 4  ;;  %s1153_s0 = sld [smem:[#allocation14_spill]]  ;;  %s163_s7 = int_to_ptr.vmem [resolvable:$true] %s162_s7 }
  0x1e   : > { %p936_p0 = pnand %p577_p13, %p894_p3  ;;  %s149_s21 = scalar_lea.sflag [#allocation3], %s918_s29 }
  0x1f   : > { %s667_s27 = scalar_lea.vmem %s163_s7, 512  ;;  %s812_s4 = smov [#allocation2]  }
  0x20   : > { %p656_p1 = pneg %p936_p0  ;;  %p668_p2 = scmp.ne.s32.totalorder %s163_s7, %s667_s27 }
  0x21   : > { %s672_s5 = sshll.u32 %s812_s4, 4  ;;  %s673_s5 = int_to_ptr.vmem [resolvable:$false] %s672_s5 }
  0x22   : > { %p670_p4 = pnand %p668_p2, %p656_p1  ;;  %s674_s6 = scalar_lea.vmem %s673_s5, 1024 }
  0x23   : > { %s161_s22 = scalar_lea.hbm %s1153_s0, %s544_s8  ;;  %p675_p6 = scmp.lt.s32.totalorder %s163_s7, %s673_s5 }
  0x24   : > { %p671_p5 = pneg %p670_p4  ;;  %p676_p3 = scmp.lt.s32.totalorder %s674_s6, %s667_s27 }
  0x26   : > { %p677_p7 = por %p676_p3, %p675_p6 }
  0x28   : > { %p678_p10 = pnand %p677_p7, %p671_p5 }
  0x2a   : > { %681 = shalt.err (!%p678_p10)
}
  0x2b   : > { %s813_s23 = smov 256   ;;  %s814_s17 = smov 128  }
  0x2c   : > { %s815_s18 = smov 8   ;;  %p548_p11 = scmp.ge.s32.totalorder %s810_s16, 1 }
  0x2d   : > { %569 = dma.hbm_to_vmem [thread:$0]  (!%p936_p0), %s161_s22, 512, %s163_s7, %s149_s21, %s813_s23, %s814_s17, %s815_s18  }
  0x2e   : > { %p194_p13 = scmp.lt.s32.totalorder %s810_s16, 5  ;;  %s185_s6 = scalar_lea.hbm %s1140_s1, %s544_s8 }
  0x2f   : > { %s176_s0 = scalar_lea.vmem [#allocation5], %s542_s3  ;;  %s173_s19 = scalar_lea.sflag [#allocation6], %s918_s29 }
  0x30   : > { %p951_p2 = pnand %p548_p11, %p194_p13  ;;  %s186_s20 = sshll.u32 %s176_s0, 4  ;;  %s187_s20 = int_to_ptr.vmem [resolvable:$true] %s186_s20 }
  0x31   : > { %s695_s15 = scalar_lea.vmem %s187_s20, 512  ;;  %s816_s7 = smov [#allocation5]  }
  0x32   : > { %p696_p4 = scmp.ne.s32.totalorder %s187_s20, %s695_s15  ;;  %s700_s22 = sshll.u32 %s816_s7, 4  ;;  %s701_s22 = int_to_ptr.vmem [resolvable:$false] %s700_s22 }
  0x33   : > { %s702_s21 = scalar_lea.vmem %s701_s22, 1024  ;;  %p703_p3 = scmp.lt.s32.totalorder %s187_s20, %s701_s22 }
  0x34   : > { %p698_p5 = pnand %p696_p4, %p656_p1  ;;  %p704_p7 = scmp.lt.s32.totalorder %s702_s21, %s695_s15 }
  0x36   : > { %p699_p6 = pneg %p698_p5  ;;  %p705_p10 = por %p704_p7, %p703_p3 }
  0x38   : > { %p706_p11 = pnand %p705_p10, %p699_p6 }
  0x3a   : > { %709 = shalt.err (!%p706_p11)
}
  0x3b   : > { %572 = dma.hbm_to_vmem [thread:$0]  (!%p936_p0), %s185_s6, 512, %s187_s20, %s173_s19, %s813_s23, %s814_s17, %s815_s18  }
  0x3c   : > { %198 = sbr.rel (%p951_p2) target bundleno = 469 (0x1d5), region = 28  ;;  %s970_s0 = sand.u32 (!%p951_p2), 1, %s786_s10  }
  0x3d   : > { %s549_s29 = sshll.u32 (!%p951_p2), %s970_s0, 5  ;;  %s201_s3 = scalar_lea.sflag (!%p951_p2), [#allocation3], %s970_s0 }
  0x3e   : > { %s974_s8 = scalar_lea.vmem (!%p951_p2), [#allocation2], %s549_s29 }
  0x41   : > { %769 = dma.done.wait (%p902_p8), %s201_s3, 512  }
  0x42   : > { %771 = vsyncadd (%p902_p8), %s201_s3, 4294966784  ;;  %s210_s15 = scalar_lea.sflag [#allocation6], %s970_s0  ;;  %s213_s19 = scalar_lea.vmem [#allocation5], %s549_s29 }
  0x43   : > { %773 = dma.done.wait (%p902_p8), %s210_s15, 512  }
  0x44   : > { %775 = vsyncadd (%p902_p8), %s210_s15, 4294966784  ;;  %v243_v0 = vld [vmem:[%s213_s19] sm:$0xff]  ;;  %v245_v1 = vld [vmem:[%s213_s19 + $0x10] sm:$0xff]  ;;  %s817_s20 = smov 16   ;;  %vm262_vm0 = vcmask 1047680   ;;  %s818_s24 = smov 113   ;;  %v260_v44 = vlaneseq }
  0x45   : > { %263 = vrot.lane.b32.xlu0 %v243_v0, %s817_s20  ;;  %269 = vrot.lane.b32.xlu1 %v245_v1, %s817_s20  ;;  %v244_v2 = vld [vmem:[%s213_s19 + $0x8] sm:$0xff]  ;;  %v246_v3 = vld [vmem:[%s213_s19 + $0x18] sm:$0xff]  ;;  %s819_s26 = smov 114   ;;  %vm251_vm1 = vcmask 130048   ;;  %s820_s23 = smov 115  }
  0x46   : > { %v992_v14 = vld [vmem:[%s974_s8] sm:$0xff]  ;;  %v995_v15 = vld [vmem:[%s974_s8 + $0x8] sm:$0xff]  ;;  %v1003_v20 = vld [vmem:[%s974_s8 + $0x10] sm:$0xff]  ;;  %s821_s17 = smov 116   ;;  %s558_s18 = smul.u32 40, %s970_s0  ;;  %v1029_v50 = vand.u32 127, %v260_v44 }
  0x47   : > { %v247_v17 = vmul.f32 %v243_v0, %v992_v14  ;;  %v248_v18 = vmul.f32 %v244_v2, %v995_v15  ;;  %v249_v23 = vmul.f32 %v245_v1, %v1003_v20  ;;  %v1012_v29 = vld [vmem:[%s974_s8 + $0x18] sm:$0xff]  ;;  %s559_s27 = smul.u32 10, %s798_s13  ;;  %s400_s21 = scalar_lea.sflag [#allocation4], %s970_s0 }
  0x48   : > { %v250_v30 = vmul.f32 %v246_v3, %v1012_v29  ;;  %s1018_s4 = scalar_lea.vmem [#allocation7], %s558_s18  ;;  %vm314_vm2 = vcmp.ge.s32.totalorder %v1029_v50, 1  ;;  %vm341_vm3 = vcmp.ge.s32.totalorder %v1029_v50, 2  ;;  %vm368_vm4 = vcmp.ge.s32.totalorder %v1029_v50, 3  ;;  %s822_s3 = smov [#allocation7]  }
  0x49   : > { %266 = vrot.lane.b32.xlu0 %v244_v2, %s817_s20  ;;  %272 = vrot.lane.b32.xlu1 %v246_v3, %s817_s20  ;;  %v252_v21 = vsel %vm251_vm1, %v247_v17, 0.0  ;;  %v253_v22 = vsel %vm251_vm1, %v248_v18, 0.0  ;;  %v255_v26 = vsel %vm251_vm1, %v249_v23, 0.0  ;;  %s413_s13 = sadd.s32 %s794_s12, %s559_s27  ;;  %s416_s5 = sshll.u32 %s1018_s4, 4  ;;  %vm395_vm5 = vcmp.ge.s32.totalorder %v1029_v50, 4  ;;  %s1073_s5 = int_to_ptr.vmem [resolvable:$true] %s416_s5 }
  0x4a   : > { %v254_v24 = vadd.f32 %v253_v22, %v252_v21  ;;  %v257_v31 = vsel %vm251_vm1, %v250_v30, 0.0  ;;  %s555_s12 = sshll.u32 %s413_s13, 7  ;;  %s710_s29 = scalar_lea.vmem %s1073_s5, 640 }
  0x4b   : > { %s1084_s22 = scalar_lea.hbm %s1141_s2, %s555_s12  ;;  %p711_p8 = scmp.ne.s32.totalorder %s1073_s5, %s710_s29 }
  0x4c   : > { %v256_v28 = vadd.f32 %v255_v26, %v254_v24  ;;  %s714_s8 = sshll.u32 %s822_s3, 4  ;;  %s715_s8 = int_to_ptr.vmem [resolvable:$false] %s714_s8 }
  0x4d   : > { %p712_p0 = pnand %p711_p8, %p906_p9  ;;  %s716_s15 = scalar_lea.vmem %s715_s8, 1280 }
  0x4e   : > { %v258_v32 = vadd.f32 %v257_v31, %v256_v28  ;;  %p717_p13 = scmp.lt.s32.totalorder %s1073_s5, %s715_s8  ;;  %p718_p2 = scmp.lt.s32.totalorder %s716_s15, %s710_s29 }
  0x4f   : > { %p713_p1 = pneg %p712_p0 }
  0x50   : > { %259 = vst.msk [vmem:[%s1018_s4] sm:$0xff] %vm251_vm1, %v258_v32  ;;  %p719_p4 = por %p718_p2, %p717_p13 }
  0x52   : > { %p720_p5 = pnand %p719_p4, %p713_p1 }
  0xb7   : > { %v264_v4 = vpop.permute.xlu0 %263  ;;  %v270_v5 = vpop.permute.xlu1 %269 }
  0xb8   : > { %v265_v6 = vsel %vm262_vm0, %v264_v4, %v243_v0  ;;  %v271_v7 = vsel %vm262_vm0, %v270_v5, %v245_v1 }
  0xb9   : > { %275 = vrot.lane.b32.xlu0 %v265_v6, %s817_s20 }
  0xbb   : > { %v267_v8 = vpop.permute.xlu0 %266  ;;  %v273_v9 = vpop.permute.xlu1 %272 }
  0xbc   : > { %v268_v10 = vsel %vm262_vm0, %v267_v8, %v244_v2  ;;  %v274_v11 = vsel %vm262_vm0, %v273_v9, %v246_v3 }
  0xbd   : > { %277 = vrot.lane.b32.xlu1 %v268_v10, %s817_s20  ;;  %279 = vrot.lane.b32.xlu0 %v271_v7, %s817_s20 }
  0xc1   : > { %281 = vrot.lane.b32.xlu1 %v274_v11, %s817_s20 }
 0x12b   : > { %v276_v12 = vpop.permute.xlu0 %275 }
 0x12c   : > { %v283_v13 = vsel %vm262_vm0, %v276_v12, %v243_v0 }
 0x12d   : > { %291 = vrot.lane.b32.xlu0 %v283_v13, %s818_s24 }
 0x12f   : > { %v278_v16 = vpop.permute.xlu1 %277  ;;  %v280_v25 = vpop.permute.xlu0 %279 }
 0x130   : > { %v284_v19 = vsel %vm262_vm0, %v278_v16, %v244_v2  ;;  %v285_v27 = vsel %vm262_vm0, %v280_v25, %v245_v1 }
 0x131   : > { %293 = vrot.lane.b32.xlu1 %v284_v19, %s818_s24  ;;  %318 = vrot.lane.b32.xlu0 %v283_v13, %s819_s26 }
 0x133   : > { %v282_v33 = vpop.permute.xlu1 %281 }
 0x134   : > { %v286_v34 = vsel %vm262_vm0, %v282_v33, %v246_v3 }
 0x135   : > { %320 = vrot.lane.b32.xlu1 %v284_v19, %s819_s26  ;;  %345 = vrot.lane.b32.xlu0 %v283_v13, %s820_s23 }
 0x139   : > { %347 = vrot.lane.b32.xlu1 %v284_v19, %s820_s23  ;;  %372 = vrot.lane.b32.xlu0 %v283_v13, %s821_s17 }
 0x13d   : > { %374 = vrot.lane.b32.xlu1 %v284_v19, %s821_s17  ;;  %295 = vrot.lane.b32.xlu0 %v285_v27, %s818_s24 }
 0x141   : > { %322 = vrot.lane.b32.xlu1 %v285_v27, %s819_s26  ;;  %349 = vrot.lane.b32.xlu0 %v285_v27, %s820_s23 }
 0x145   : > { %376 = vrot.lane.b32.xlu1 %v285_v27, %s821_s17  ;;  %297 = vrot.lane.b32.xlu0 %v286_v34, %s818_s24 }
 0x149   : > { %324 = vrot.lane.b32.xlu1 %v286_v34, %s819_s26  ;;  %351 = vrot.lane.b32.xlu0 %v286_v34, %s820_s23 }
 0x14d   : > { %378 = vrot.lane.b32.xlu1 %v286_v34, %s821_s17 }
 0x19f   : > { %v292_v35 = vpop.permute.xlu0 %291 }
 0x1a0   : > { %v303_v46 = vmul.f32 %v292_v35, %v992_v14 }
 0x1a2   : > { %v307_v56 = vsel %vm251_vm1, %v303_v46, 0.0 }
 0x1a3   : > { %v294_v36 = vpop.permute.xlu1 %293  ;;  %v319_v37 = vpop.permute.xlu0 %318 }
 0x1a4   : > { %v304_v45 = vmul.f32 %v294_v36, %v995_v15  ;;  %v330_v54 = vmul.f32 %v319_v37, %v992_v14 }
 0x1a6   : > { %v308_v51 = vsel %vm251_vm1, %v304_v45, 0.0  ;;  %v334_v3 = vsel %vm251_vm1, %v330_v54, 0.0 }
 0x1a7   : > { %v321_v38 = vpop.permute.xlu1 %320  ;;  %v346_v39 = vpop.permute.xlu0 %345  ;;  %v309_v60 = vadd.f32 %v308_v51, %v307_v56 }
 0x1a8   : > { %v331_v52 = vmul.f32 %v321_v38, %v995_v15  ;;  %v357_v55 = vmul.f32 %v346_v39, %v992_v14 }
 0x1aa   : > { %v335_v63 = vsel %vm251_vm1, %v331_v52, 0.0  ;;  %v361_v4 = vsel %vm251_vm1, %v357_v55, 0.0 }
 0x1ab   : > { %v348_v40 = vpop.permute.xlu1 %347  ;;  %v373_v41 = vpop.permute.xlu0 %372  ;;  %v336_v11 = vadd.f32 %v335_v63, %v334_v3 }
 0x1ac   : > { %v358_v53 = vmul.f32 %v348_v40, %v995_v15  ;;  %v384_v5 = vmul.f32 %v373_v41, %v992_v14 }
 0x1ae   : > { %v362_v0 = vsel %vm251_vm1, %v358_v53, 0.0  ;;  %v388_v22 = vsel %vm251_vm1, %v384_v5, 0.0 }
 0x1af   : > { %v375_v42 = vpop.permute.xlu1 %374  ;;  %v296_v43 = vpop.permute.xlu0 %295  ;;  %v363_v12 = vadd.f32 %v362_v0, %v361_v4 }
 0x1b0   : > { %v305_v47 = vmul.f32 %v296_v43, %v1003_v20  ;;  %v385_v1 = vmul.f32 %v375_v42, %v995_v15 }
 0x1b2   : > { %v310_v57 = vsel %vm251_vm1, %v305_v47, 0.0  ;;  %v389_v14 = vsel %vm251_vm1, %v385_v1, 0.0 }
 0x1b3   : > { %v323_v48 = vpop.permute.xlu1 %322  ;;  %v350_v49 = vpop.permute.xlu0 %349  ;;  %v311_v6 = vadd.f32 %v310_v57, %v309_v60  ;;  %v390_v26 = vadd.f32 %v389_v14, %v388_v22 }
 0x1b4   : > { %v332_v58 = vmul.f32 %v323_v48, %v1003_v20  ;;  %v359_v59 = vmul.f32 %v350_v49, %v1003_v20 }
 0x1b6   : > { %v337_v7 = vsel %vm251_vm1, %v332_v58, 0.0  ;;  %v364_v8 = vsel %vm251_vm1, %v359_v59, 0.0 }
 0x1b7   : > { %v377_v61 = vpop.permute.xlu1 %376  ;;  %v298_v62 = vpop.permute.xlu0 %297  ;;  %v338_v19 = vadd.f32 %v337_v7, %v336_v11  ;;  %v365_v21 = vadd.f32 %v364_v8, %v363_v12 }
 0x1b8   : > { %v306_v2 = vmul.f32 %v298_v62, %v1012_v29  ;;  %v386_v9 = vmul.f32 %v377_v61, %v1003_v20 }
 0x1ba   : > { %v312_v10 = vsel %vm251_vm1, %v306_v2, 0.0  ;;  %v391_v23 = vsel %vm251_vm1, %v386_v9, 0.0 }
 0x1bb   : > { %v313_v13 = vadd.f32 %v312_v10, %v311_v6  ;;  %v325_v15 = vpop.permute.xlu1 %324  ;;  %v352_v16 = vpop.permute.xlu0 %351  ;;  %v392_v32 = vadd.f32 %v391_v23, %v390_v26 }
 0x1bc   : > { %v333_v17 = vmul.f32 %v325_v15, %v1012_v29  ;;  %v360_v18 = vmul.f32 %v352_v16, %v1012_v29 }
 0x1bd   : > { %v315_v20 = vsel %vm314_vm2, %v313_v13, 0.0 }
 0x1be   : > { %551 = vst.msk [vmem:[%s1018_s4 + $0x8] sm:$0xff] %vm251_vm1, %v315_v20  ;;  %v339_v24 = vsel %vm251_vm1, %v333_v17, 0.0  ;;  %v366_v25 = vsel %vm251_vm1, %v360_v18, 0.0 }
 0x1bf   : > { %v340_v27 = vadd.f32 %v339_v24, %v338_v19  ;;  %v367_v28 = vadd.f32 %v366_v25, %v365_v21  ;;  %v379_v30 = vpop.permute.xlu1 %378 }
 0x1c0   : > { %v387_v31 = vmul.f32 %v379_v30, %v1012_v29 }
 0x1c1   : > { %v342_v33 = vsel %vm341_vm3, %v340_v27, 0.0  ;;  %v369_v34 = vsel %vm368_vm4, %v367_v28, 0.0 }
 0x1c2   : > { %552 = vst.msk [vmem:[%s1018_s4 + $0x10] sm:$0xff] %vm251_vm1, %v342_v33  ;;  %553 = vst.msk [vmem:[%s1018_s4 + $0x18] sm:$0xff] %vm251_vm1, %v369_v34  ;;  %v393_v29 = vsel %vm251_vm1, %v387_v31, 0.0 }
 0x1c3   : > { %v394_v35 = vadd.f32 %v393_v29, %v392_v32 }
 0x1c5   : > { %v396_v36 = vsel %vm395_vm5, %v394_v35, 0.0 }
 0x1c6   : > { %554 = vst.msk [vmem:[%s1018_s4 + $0x20] sm:$0xff] %vm251_vm1, %v396_v36 }
 0x1c7   : > { %723 = shalt.err (!%p720_p5)
}
 0x1c8   : > { %s724_s19 = scalar_lea.hbm %s1084_s22, 640  ;;  %s728_s26 = scalar_lea.hbm %s1141_s2, 2560 }
 0x1c9   : > { %p725_p6 = scmp.ne.s32.totalorder %s1084_s22, %s724_s19  ;;  %p729_p10 = scmp.lt.s32.totalorder %s1084_s22, %s1141_s2 }
 0x1ca   : > { %p730_p11 = scmp.lt.s32.totalorder %s728_s26, %s724_s19 }
 0x1cb   : > { %p726_p3 = pnand %p725_p6, %p906_p9 }
 0x1cc   : > { %p731_p8 = por %p730_p11, %p729_p10 }
 0x1cd   : > { %p727_p7 = pneg %p726_p3 }
 0x1cf   : > { %p732_p0 = pnand %p731_p8, %p727_p7 }
 0x1d1   : > { %735 = shalt.err (!%p732_p0)
}
 0x1d2   : > { %s823_s18 = smov 128   ;;  %s824_s4 = smov 256  }
 0x1d3   : > { %s825_s27 = smov 8  }
 0x1d4   : > { %564 = dma.vmem_to_hbm [thread:$0]  (%p906_p9), %s1073_s5, 640, %s1084_s22, %s400_s21, %s823_s18, %s824_s4, %s825_s27  }
 0x1d5 PF: > { %p578_p1 = scmp.ge.s32.totalorder %s810_s16, 2  ;;  %s431_s13 = sand.u32 1, %s782_s9  }
 0x1d6   : > { %s432_s12 = scalar_lea.sflag [#allocation4], %s431_s13 }
 0x1d7   : > { %p574_p13 = pnand %p578_p1, %p912_p12 }
 0x1d9   : > { %p575_p2 = pneg %p574_p13 }
 0x1db   : > { %777 = dma.done.wait (%p575_p2), %s432_s12, 640  }
 0x1dc   : > { %779 = vsyncadd (%p575_p2), %s432_s12, 4294966656  ;;  %s21_s16 = sadd.s32 1, %s810_s16   ;;  %s1156_s13 = sld [smem:[#allocation11_spill]] }
 0x1dd   : > { %p18_p4 = scmp.ge.s32.totalorder %s21_s16, 6   ;;  %s1157_s25 = sld [smem:[#allocation12_spill]] }
 0x1de   : > { %s1158_s15 = sld [smem:[#allocation13_spill]]  ;;  %s1159_s9 = smov %s786_s10 }
 0x1df   : > { %s1160_s10 = smov %s790_s11  ;;  %s1161_s11 = smov %s921_s30 }
 0x1e0   : > { %s1162_s12 = smov %s802_s14  ;;  %20 = sbr.rel (!%p18_p4) target bundleno = 11 (0xb), region = 90 }
 0x1e3   : > { %s1163_s14 = smov %s1157_s25 }
 0x1e5   :  { %437 = vsyncpa [#allocation3], 1 }
 0x1e6   :  { %439 = vsyncpa [#allocation3 + $0x1], 1 }
 0x1e7   :  { %440 = vsyncpa [#allocation6], 1 }
 0x1e8   :  { %442 = vsyncpa [#allocation6 + $0x1], 1 }
 0x1e9   :  { %443 = vsyncpa [#allocation4], 1 }
 0x1ea   :  { %445 = vsyncpa [#allocation4 + $0x1], 1 }

</bundles_post_ra>
